<compile_context>
chip_gen: v6e
topology: v6e:2x2x1
jax: 0.10.0
libtpu: 0.0.40
codegen_flags: <defaults>
</compile_context>

<pallas_src>
import functools

import numpy as np
import jax
import jax.numpy as jnp
from jax import lax
from jax.experimental import pallas as pl
from jax.experimental.pallas import tpu as pltpu


# ----------------------------------------------------------------------- pallas kernel
def _attention_kernel(x_ref, wq_ref, wk_ref, wv_ref, wout_ref, b_ref, o_ref,
                      *, heads, dim_head, n_valid):
    """One batch element, all heads, fully in VMEM / on the MXU.

    x_ref    : (1, Np, dim)  bf16 tokens of this batch (Np = padded seq len)
    wq/k/v   : (dim, inner)  bf16 packed projection weights (scale folded into Wq)
    wout_ref : (inner, dim)  bf16 output-projection weight
    b_ref    : (1, dim)      f32 output-projection bias
    o_ref    : (1, Np, dim)  output block
    """
    x = x_ref[0]                                        # (Np, dim) bf16
    n_pad = x.shape[0]
    d = dim_head

    # Lane-dense head-group projections: ONE MXU matmul per Q/K/V.
    q = jnp.dot(x, wq_ref[...], preferred_element_type=jnp.float32)   # (Np, inner)
    k = jnp.dot(x, wk_ref[...], preferred_element_type=jnp.float32)
    v = jnp.dot(x, wv_ref[...], preferred_element_type=jnp.float32)
    qb = q.astype(jnp.bfloat16)
    kb = k.astype(jnp.bfloat16)
    vb = v.astype(jnp.bfloat16)

    # Key-padding bias (only materialized when the sequence was padded).
    if n_valid < n_pad:
        key_col = lax.broadcasted_iota(jnp.int32, (n_pad, n_pad), 1)
        key_bias = jnp.where(key_col < n_valid, 0.0, -1e30).astype(jnp.float32)
    else:
        key_bias = None

    av_parts = []
    for h in range(heads):                               # static unroll over heads
        qh = qb[:, h * d:(h + 1) * d]                    # (Np, d)
        kh = kb[:, h * d:(h + 1) * d]
        vh = vb[:, h * d:(h + 1) * d]

        # scores: contract the head dim directly (no transpose materialized)
        dots = lax.dot_general(qh, kh, (((1,), (1,)), ((), ())),
                               preferred_element_type=jnp.float32)    # (Np, Np) f32
        if key_bias is not None:
            dots = dots + key_bias

        # numerically-stable softmax (stats kept in f32)
        m = jnp.max(dots, axis=-1, keepdims=True)
        p = jnp.exp(dots - m)
        l = jnp.sum(p, axis=-1, keepdims=True)
        inv_l = pl.reciprocal(l, approx=True)            # EUP slot, ~free

        av = jnp.dot(p.astype(jnp.bfloat16), vh,
                     preferred_element_type=jnp.float32)              # (Np, d)
        av_parts.append(av * inv_l)

    av_all = av_parts[0] if heads == 1 else jnp.concatenate(av_parts, axis=-1)
    av_all = av_all.astype(jnp.bfloat16)                               # (Np, inner)

    # Deferred output projection: ONE deep-K matmul + bias, f32 accumulation.
    out = jnp.dot(av_all, wout_ref[...], preferred_element_type=jnp.float32)
    o_ref[0] = (out + b_ref[...]).astype(o_ref.dtype)


# ----------------------------------------------------------------------- wrapper
def _estimate_vmem_bytes(n_pad, dim, inner):
    bf16, f32 = 2, 4
    io = 2 * n_pad * dim * bf16 + 2 * n_pad * dim * f32            # x / out (double-buffered)
    w = 2 * ((3 * dim * inner + inner * dim) * bf16 + dim * f32)   # resident weights + bias
    tmp = (6 * n_pad * inner + 3 * n_pad * n_pad + 2 * n_pad * dim) * f32
    return io + w + tmp


def attention_forward(x, wq, wk, wv, wout, bias, *, heads, dim_head):
    """x: (B, N, dim); wq/wk/wv: (dim, inner) bf16 (scale pre-folded into wq);
    wout: (inner, dim) bf16; bias: (1, dim) f32."""
    B, N, dim = x.shape
    inner = heads * dim_head

    n_pad = max(8, -(-N // 8) * 8)                 # pad seq len to a multiple of 8
    x_p = x if n_pad == N else jnp.pad(x, ((0, 0), (0, n_pad - N), (0, 0)))
    x_b = x_p.astype(jnp.bfloat16)                 # bf16 operands, half the DMA bytes

    kernel = functools.partial(_attention_kernel, heads=heads,
                               dim_head=dim_head, n_valid=N)

    vmem_limit = int(min(64 * 2**20,
                         max(32 * 2**20, 2 * _estimate_vmem_bytes(n_pad, dim, inner))))

    out = pl.pallas_call(
        kernel,
        out_shape=jax.ShapeDtypeStruct((B, n_pad, dim), x.dtype),
        grid=(B,),
        in_specs=[
            pl.BlockSpec((1, n_pad, dim), lambda b: (b, 0, 0)),   # x (per batch element)
            pl.BlockSpec((dim, inner), lambda b: (0, 0)),         # Wq  (grid-resident)
            pl.BlockSpec((dim, inner), lambda b: (0, 0)),         # Wk  (grid-resident)
            pl.BlockSpec((dim, inner), lambda b: (0, 0)),         # Wv  (grid-resident)
            pl.BlockSpec((inner, dim), lambda b: (0, 0)),         # Wout (grid-resident)
            pl.BlockSpec((1, dim), lambda b: (0, 0)),             # bias (grid-resident)
        ],
        out_specs=pl.BlockSpec((1, n_pad, dim), lambda b: (b, 0, 0)),
        compiler_params=pltpu.CompilerParams(
            dimension_semantics=("parallel",),
            vmem_limit_bytes=vmem_limit),
    )(x_b, wq, wk, wv, wout, bias)

    return out if n_pad == N else out[:, :N, :]


# ----------------------------------------------------------------------- module
class Attention:
    """JAX/Pallas port of the PyTorch Attention module (forward only, inference)."""

    def __init__(self, dim, heads=8, dim_head=64, dropout=0.0, key=None):
        inner = heads * dim_head
        self.dim, self.heads, self.dim_head = dim, heads, dim_head
        self.scale = dim_head ** -0.5
        self.project_out = not (heads == 1 and dim_head == dim)

        key = jax.random.PRNGKey(0) if key is None else key
        k1, k2, k3 = jax.random.split(key, 3)

        # Synthetic deterministic init (matches nn.Linear fan-in uniform ranges).
        s_qkv = 1.0 / np.sqrt(dim)
        w_qkv = jax.random.uniform(k1, (dim, 3 * inner), jnp.float32, -s_qkv, s_qkv)
        if self.project_out:
            s_out = 1.0 / np.sqrt(inner)
            w_out = jax.random.uniform(k2, (inner, dim), jnp.float32, -s_out, s_out)
            b_out = jax.random.uniform(k3, (dim,), jnp.float32, -s_out, s_out)
        else:
            w_out = jnp.eye(inner, dim, dtype=jnp.float32)   # nn.Identity() folded in
            b_out = jnp.zeros((dim,), jnp.float32)

        # f32 originals kept only for the pure-JAX reference check.
        self.w_qkv, self.w_out, self.b_out = w_qkv, w_out, b_out

        # One-time weight packing (per review): split fused QKV, fold `scale` into Wq,
        # cast the matmul operands to bf16. Done once here, not per forward call.
        self.wq_p = (w_qkv[:, :inner] * self.scale).astype(jnp.bfloat16)
        self.wk_p = w_qkv[:, inner:2 * inner].astype(jnp.bfloat16)
        self.wv_p = w_qkv[:, 2 * inner:].astype(jnp.bfloat16)
        self.wout_p = w_out.astype(jnp.bfloat16)
        self.b_p = b_out.reshape(1, dim).astype(jnp.float32)
        # dropout == 0.0 -> inference no-op.

    def __call__(self, x):
        return attention_forward(x, self.wq_p, self.wk_p, self.wv_p,
                                 self.wout_p, self.b_p,
                                 heads=self.heads, dim_head=self.dim_head)


# -------------------------------------------------------------------- pure-JAX reference
def attention_ref(x, w_qkv, w_out, b_out, heads):
    B, N, dim = x.shape
    inner = w_qkv.shape[1] // 3
    d = inner // heads
    scale = float(d) ** -0.5

    qkv = x @ w_qkv
    q, k, v = jnp.split(qkv, 3, axis=-1)

    def to_heads(t):
        return t.reshape(B, N, heads, d).transpose(0, 2, 1, 3)

    q, k, v = to_heads(q), to_heads(k), to_heads(v)
    dots = jnp.einsum("bhid,bhjd->bhij", q, k) * scale
    attn = jax.nn.softmax(dots, axis=-1)
    out = jnp.einsum("bhij,bhjd->bhid", attn, v)
    out = out.transpose(0, 2, 1, 3).reshape(B, N, inner)
    return out @ w_out + b_out


# ------------------------------------------------------------------------------- main
if __name__ == "__main__":
    key = jax.random.PRNGKey(0)
    kx, kp1, kp2, kx2 = jax.random.split(key, 4)

    # Small shapes implied by the module: batch=2, seq=8, dim=32, heads=4, dim_head=16.
    B, N, dim = 2, 8, 32
    heads, dim_head = 4, 16
    x = jax.random.normal(kx, (B, N, dim), jnp.float32)

    m1 = Attention(dim, heads=heads, dim_head=dim_head, key=kp1)
    y1 = jax.block_until_ready(m1(x))
    assert y1.shape == (B, N, dim)
    r1 = attention_ref(x, m1.w_qkv, m1.w_out, m1.b_out, heads)
    assert bool(jnp.allclose(y1, r1, atol=5e-2, rtol=5e-2)), float(jnp.max(jnp.abs(y1 - r1)))

    # project_out=False path: heads=1, dim_head=dim -> to_out is Identity.
    m2 = Attention(dim, heads=1, dim_head=dim, key=kp2)
    y2 = jax.block_until_ready(m2(x))
    assert y2.shape == (B, N, dim)
    r2 = attention_ref(x, m2.w_qkv, m2.w_out, m2.b_out, 1)
    assert bool(jnp.allclose(y2, r2, atol=5e-2, rtol=5e-2)), float(jnp.max(jnp.abs(y2 - r2)))

    # Non-multiple-of-8 sequence length exercises the padding + key-mask path.
    x7 = jax.random.normal(kx2, (B, 7, dim), jnp.float32)
    y3 = jax.block_until_ready(m1(x7))
    assert y3.shape == (B, 7, dim)
    r3 = attention_ref(x7, m1.w_qkv, m1.w_out, m1.b_out, heads)
    assert bool(jnp.allclose(y3, r3, atol=5e-2, rtol=5e-2)), float(jnp.max(jnp.abs(y3 - r3)))

    print("KERNEL_OK")
</pallas_src>

<mosaic_0001>
module attributes {stable_mosaic.version = 11 : i64} {
  func.func @_attention_kernel(%arg0: i32, %arg1: memref<1x8x32xbf16, #tpu.memory_space<vmem>>, %arg2: memref<32x64xbf16, #tpu.memory_space<vmem>>, %arg3: memref<32x64xbf16, #tpu.memory_space<vmem>>, %arg4: memref<32x64xbf16, #tpu.memory_space<vmem>>, %arg5: memref<64x32xbf16, #tpu.memory_space<vmem>>, %arg6: memref<1x32xf32, #tpu.memory_space<vmem>>, %arg7: memref<1x8x32xf32, #tpu.memory_space<vmem>>) attributes {dimension_semantics = [#tpu.dimension_semantics<parallel>], iteration_bounds = array<i64: 2>, scalar_prefetch = 0 : i64, scratch_operands = 0 : i64, tpu.core_type = #tpu.core_type<tc>, window_params = [{transform_indices = @transform_0, window_bounds = array<i64: 1, 8, 32>}, {pipeline_mode = #tpu.pipeline_mode<synchronous>, transform_indices = @transform_1, window_bounds = array<i64: 32, 64>}, {pipeline_mode = #tpu.pipeline_mode<synchronous>, transform_indices = @transform_2, window_bounds = array<i64: 32, 64>}, {pipeline_mode = #tpu.pipeline_mode<synchronous>, transform_indices = @transform_3, window_bounds = array<i64: 32, 64>}, {pipeline_mode = #tpu.pipeline_mode<synchronous>, transform_indices = @transform_4, window_bounds = array<i64: 64, 32>}, {pipeline_mode = #tpu.pipeline_mode<synchronous>, transform_indices = @transform_5, window_bounds = array<i64: 1, 32>}, {transform_indices = @transform_6, window_bounds = array<i64: 1, 8, 32>}]} {
    %c0 = arith.constant 0 : index
    %c0_0 = arith.constant 0 : index
    %c0_1 = arith.constant 0 : index
    %0 = vector.load %arg1[%c0, %c0_0, %c0_1] : memref<1x8x32xbf16, #tpu.memory_space<vmem>>, vector<1x8x32xbf16>
    %1 = vector.shape_cast %0 : vector<1x8x32xbf16> to vector<8x32xbf16>
    %c0_2 = arith.constant 0 : index
    %c0_3 = arith.constant 0 : index
    %2 = vector.load %arg2[%c0_2, %c0_3] : memref<32x64xbf16, #tpu.memory_space<vmem>>, vector<32x64xbf16>
    %cst = arith.constant dense<0.000000e+00> : vector<8x64xf32>
    %3 = tpu.matmul %1, %2, %cst {dimension_numbers = #tpu.dot_dimension_numbers<[1], [0], [0], [1], [0, 0, 1, 1], [], []>} : vector<8x32xbf16>, vector<32x64xbf16>, vector<8x64xf32> -> vector<8x64xf32>
    %c0_4 = arith.constant 0 : index
    %c0_5 = arith.constant 0 : index
    %4 = vector.load %arg3[%c0_4, %c0_5] : memref<32x64xbf16, #tpu.memory_space<vmem>>, vector<32x64xbf16>
    %cst_6 = arith.constant dense<0.000000e+00> : vector<8x64xf32>
    %5 = tpu.matmul %1, %4, %cst_6 {dimension_numbers = #tpu.dot_dimension_numbers<[1], [0], [0], [1], [0, 0, 1, 1], [], []>} : vector<8x32xbf16>, vector<32x64xbf16>, vector<8x64xf32> -> vector<8x64xf32>
    %c0_7 = arith.constant 0 : index
    %c0_8 = arith.constant 0 : index
    %6 = vector.load %arg4[%c0_7, %c0_8] : memref<32x64xbf16, #tpu.memory_space<vmem>>, vector<32x64xbf16>
    %cst_9 = arith.constant dense<0.000000e+00> : vector<8x64xf32>
    %7 = tpu.matmul %1, %6, %cst_9 {dimension_numbers = #tpu.dot_dimension_numbers<[1], [0], [0], [1], [0, 0, 1, 1], [], []>} : vector<8x32xbf16>, vector<32x64xbf16>, vector<8x64xf32> -> vector<8x64xf32>
    %8 = arith.truncf %3 : vector<8x64xf32> to vector<8x64xbf16>
    %9 = arith.truncf %5 : vector<8x64xf32> to vector<8x64xbf16>
    %10 = arith.truncf %7 : vector<8x64xf32> to vector<8x64xbf16>
    %11 = vector.extract_strided_slice %8 {offsets = [0, 0], sizes = [8, 16], strides = [1, 1]} : vector<8x64xbf16> to vector<8x16xbf16>
    %12 = vector.extract_strided_slice %9 {offsets = [0, 0], sizes = [8, 16], strides = [1, 1]} : vector<8x64xbf16> to vector<8x16xbf16>
    %13 = vector.extract_strided_slice %10 {offsets = [0, 0], sizes = [8, 16], strides = [1, 1]} : vector<8x64xbf16> to vector<8x16xbf16>
    %cst_10 = arith.constant dense<0.000000e+00> : vector<8x8xf32>
    %14 = tpu.matmul %11, %12, %cst_10 {dimension_numbers = #tpu.dot_dimension_numbers<[1], [1], [0], [0], [0, 0, 1, 0], [], []>} : vector<8x16xbf16>, vector<8x16xbf16>, vector<8x8xf32> -> vector<8x8xf32>
    %cst_11 = arith.constant dense<0xFF800000> : vector<8xf32>
    %15 = vector.multi_reduction <maximumf>, %14, %cst_11 [1] : vector<8x8xf32> to vector<8xf32>
    %16 = vector.shape_cast %15 : vector<8xf32> to vector<8x1xf32>
    %17 = vector.broadcast %16 : vector<8x1xf32> to vector<8x8xf32>
    %18 = arith.subf %14, %17 : vector<8x8xf32>
    %19 = math.exp %18 : vector<8x8xf32>
    %cst_12 = arith.constant dense<0.000000e+00> : vector<8xf32>
    %20 = vector.multi_reduction <add>, %19, %cst_12 [1] : vector<8x8xf32> to vector<8xf32>
    %21 = vector.shape_cast %20 : vector<8xf32> to vector<8x1xf32>
    %22 = tpu.reciprocal %21 {approx = true} : vector<8x1xf32> -> vector<8x1xf32>
    %23 = arith.truncf %19 : vector<8x8xf32> to vector<8x8xbf16>
    %cst_13 = arith.constant dense<0.000000e+00> : vector<8x16xf32>
    %24 = tpu.matmul %23, %13, %cst_13 {dimension_numbers = #tpu.dot_dimension_numbers<[1], [0], [0], [1], [0, 0, 1, 1], [], []>} : vector<8x8xbf16>, vector<8x16xbf16>, vector<8x16xf32> -> vector<8x16xf32>
    %25 = vector.broadcast %22 : vector<8x1xf32> to vector<8x16xf32>
    %26 = arith.mulf %24, %25 : vector<8x16xf32>
    %27 = vector.extract_strided_slice %8 {offsets = [0, 16], sizes = [8, 16], strides = [1, 1]} : vector<8x64xbf16> to vector<8x16xbf16>
    %28 = vector.extract_strided_slice %9 {offsets = [0, 16], sizes = [8, 16], strides = [1, 1]} : vector<8x64xbf16> to vector<8x16xbf16>
    %29 = vector.extract_strided_slice %10 {offsets = [0, 16], sizes = [8, 16], strides = [1, 1]} : vector<8x64xbf16> to vector<8x16xbf16>
    %cst_14 = arith.constant dense<0.000000e+00> : vector<8x8xf32>
    %30 = tpu.matmul %27, %28, %cst_14 {dimension_numbers = #tpu.dot_dimension_numbers<[1], [1], [0], [0], [0, 0, 1, 0], [], []>} : vector<8x16xbf16>, vector<8x16xbf16>, vector<8x8xf32> -> vector<8x8xf32>
    %cst_15 = arith.constant dense<0xFF800000> : vector<8xf32>
    %31 = vector.multi_reduction <maximumf>, %30, %cst_15 [1] : vector<8x8xf32> to vector<8xf32>
    %32 = vector.shape_cast %31 : vector<8xf32> to vector<8x1xf32>
    %33 = vector.broadcast %32 : vector<8x1xf32> to vector<8x8xf32>
    %34 = arith.subf %30, %33 : vector<8x8xf32>
    %35 = math.exp %34 : vector<8x8xf32>
    %cst_16 = arith.constant dense<0.000000e+00> : vector<8xf32>
    %36 = vector.multi_reduction <add>, %35, %cst_16 [1] : vector<8x8xf32> to vector<8xf32>
    %37 = vector.shape_cast %36 : vector<8xf32> to vector<8x1xf32>
    %38 = tpu.reciprocal %37 {approx = true} : vector<8x1xf32> -> vector<8x1xf32>
    %39 = arith.truncf %35 : vector<8x8xf32> to vector<8x8xbf16>
    %cst_17 = arith.constant dense<0.000000e+00> : vector<8x16xf32>
    %40 = tpu.matmul %39, %29, %cst_17 {dimension_numbers = #tpu.dot_dimension_numbers<[1], [0], [0], [1], [0, 0, 1, 1], [], []>} : vector<8x8xbf16>, vector<8x16xbf16>, vector<8x16xf32> -> vector<8x16xf32>
    %41 = vector.broadcast %38 : vector<8x1xf32> to vector<8x16xf32>
    %42 = arith.mulf %40, %41 : vector<8x16xf32>
    %43 = vector.extract_strided_slice %8 {offsets = [0, 32], sizes = [8, 16], strides = [1, 1]} : vector<8x64xbf16> to vector<8x16xbf16>
    %44 = vector.extract_strided_slice %9 {offsets = [0, 32], sizes = [8, 16], strides = [1, 1]} : vector<8x64xbf16> to vector<8x16xbf16>
    %45 = vector.extract_strided_slice %10 {offsets = [0, 32], sizes = [8, 16], strides = [1, 1]} : vector<8x64xbf16> to vector<8x16xbf16>
    %cst_18 = arith.constant dense<0.000000e+00> : vector<8x8xf32>
    %46 = tpu.matmul %43, %44, %cst_18 {dimension_numbers = #tpu.dot_dimension_numbers<[1], [1], [0], [0], [0, 0, 1, 0], [], []>} : vector<8x16xbf16>, vector<8x16xbf16>, vector<8x8xf32> -> vector<8x8xf32>
    %cst_19 = arith.constant dense<0xFF800000> : vector<8xf32>
    %47 = vector.multi_reduction <maximumf>, %46, %cst_19 [1] : vector<8x8xf32> to vector<8xf32>
    %48 = vector.shape_cast %47 : vector<8xf32> to vector<8x1xf32>
    %49 = vector.broadcast %48 : vector<8x1xf32> to vector<8x8xf32>
    %50 = arith.subf %46, %49 : vector<8x8xf32>
    %51 = math.exp %50 : vector<8x8xf32>
    %cst_20 = arith.constant dense<0.000000e+00> : vector<8xf32>
    %52 = vector.multi_reduction <add>, %51, %cst_20 [1] : vector<8x8xf32> to vector<8xf32>
    %53 = vector.shape_cast %52 : vector<8xf32> to vector<8x1xf32>
    %54 = tpu.reciprocal %53 {approx = true} : vector<8x1xf32> -> vector<8x1xf32>
    %55 = arith.truncf %51 : vector<8x8xf32> to vector<8x8xbf16>
    %cst_21 = arith.constant dense<0.000000e+00> : vector<8x16xf32>
    %56 = tpu.matmul %55, %45, %cst_21 {dimension_numbers = #tpu.dot_dimension_numbers<[1], [0], [0], [1], [0, 0, 1, 1], [], []>} : vector<8x8xbf16>, vector<8x16xbf16>, vector<8x16xf32> -> vector<8x16xf32>
    %57 = vector.broadcast %54 : vector<8x1xf32> to vector<8x16xf32>
    %58 = arith.mulf %56, %57 : vector<8x16xf32>
    %59 = vector.extract_strided_slice %8 {offsets = [0, 48], sizes = [8, 16], strides = [1, 1]} : vector<8x64xbf16> to vector<8x16xbf16>
    %60 = vector.extract_strided_slice %9 {offsets = [0, 48], sizes = [8, 16], strides = [1, 1]} : vector<8x64xbf16> to vector<8x16xbf16>
    %61 = vector.extract_strided_slice %10 {offsets = [0, 48], sizes = [8, 16], strides = [1, 1]} : vector<8x64xbf16> to vector<8x16xbf16>
    %cst_22 = arith.constant dense<0.000000e+00> : vector<8x8xf32>
    %62 = tpu.matmul %59, %60, %cst_22 {dimension_numbers = #tpu.dot_dimension_numbers<[1], [1], [0], [0], [0, 0, 1, 0], [], []>} : vector<8x16xbf16>, vector<8x16xbf16>, vector<8x8xf32> -> vector<8x8xf32>
    %cst_23 = arith.constant dense<0xFF800000> : vector<8xf32>
    %63 = vector.multi_reduction <maximumf>, %62, %cst_23 [1] : vector<8x8xf32> to vector<8xf32>
    %64 = vector.shape_cast %63 : vector<8xf32> to vector<8x1xf32>
    %65 = vector.broadcast %64 : vector<8x1xf32> to vector<8x8xf32>
    %66 = arith.subf %62, %65 : vector<8x8xf32>
    %67 = math.exp %66 : vector<8x8xf32>
    %cst_24 = arith.constant dense<0.000000e+00> : vector<8xf32>
    %68 = vector.multi_reduction <add>, %67, %cst_24 [1] : vector<8x8xf32> to vector<8xf32>
    %69 = vector.shape_cast %68 : vector<8xf32> to vector<8x1xf32>
    %70 = tpu.reciprocal %69 {approx = true} : vector<8x1xf32> -> vector<8x1xf32>
    %71 = arith.truncf %67 : vector<8x8xf32> to vector<8x8xbf16>
    %cst_25 = arith.constant dense<0.000000e+00> : vector<8x16xf32>
    %72 = tpu.matmul %71, %61, %cst_25 {dimension_numbers = #tpu.dot_dimension_numbers<[1], [0], [0], [1], [0, 0, 1, 1], [], []>} : vector<8x8xbf16>, vector<8x16xbf16>, vector<8x16xf32> -> vector<8x16xf32>
    %73 = vector.broadcast %70 : vector<8x1xf32> to vector<8x16xf32>
    %74 = arith.mulf %72, %73 : vector<8x16xf32>
    %75 = tpu.concatenate %26, %42, %58, %74 in 1 : vector<8x16xf32>, vector<8x16xf32>, vector<8x16xf32>, vector<8x16xf32> -> vector<8x64xf32>
    %76 = arith.truncf %75 : vector<8x64xf32> to vector<8x64xbf16>
    %c0_26 = arith.constant 0 : index
    %c0_27 = arith.constant 0 : index
    %77 = vector.load %arg5[%c0_26, %c0_27] : memref<64x32xbf16, #tpu.memory_space<vmem>>, vector<64x32xbf16>
    %cst_28 = arith.constant dense<0.000000e+00> : vector<8x32xf32>
    %78 = tpu.matmul %76, %77, %cst_28 {dimension_numbers = #tpu.dot_dimension_numbers<[1], [0], [0], [1], [0, 0, 1, 1], [], []>} : vector<8x64xbf16>, vector<64x32xbf16>, vector<8x32xf32> -> vector<8x32xf32>
    %c0_29 = arith.constant 0 : index
    %c0_30 = arith.constant 0 : index
    %79 = vector.load %arg6[%c0_29, %c0_30] : memref<1x32xf32, #tpu.memory_space<vmem>>, vector<1x32xf32>
    %80 = vector.broadcast %79 : vector<1x32xf32> to vector<8x32xf32>
    %81 = arith.addf %78, %80 : vector<8x32xf32>
    %c0_31 = arith.constant 0 : index
    %c0_32 = arith.constant 0 : index
    %c0_33 = arith.constant 0 : index
    %82 = vector.load %arg7[%c0_31, %c0_32, %c0_33] : memref<1x8x32xf32, #tpu.memory_space<vmem>>, vector<1x8x32xf32>
    %83 = vector.shape_cast %82 : vector<1x8x32xf32> to vector<8x32xf32>
    %84 = vector.shape_cast %81 : vector<8x32xf32> to vector<1x8x32xf32>
    tpu.vector_store %arg7[%c0_31, %c0_32, %c0_33], %84 {strides = array<i32>} : memref<1x8x32xf32, #tpu.memory_space<vmem>>, vector<1x8x32xf32>,
    return
  }
  func.func @transform_0(%arg0: i32) -> (i32, i32, i32) {
    %c0_i32 = arith.constant 0 : i32
    %c0_i32_0 = arith.constant 0 : i32
    %c0_i32_1 = arith.constant 0 : i32
    return %arg0, %c0_i32, %c0_i32_0 : i32, i32, i32
  }
  func.func @transform_1(%arg0: i32) -> (i32, i32) {
    %c0_i32 = arith.constant 0 : i32
    %c0_i32_0 = arith.constant 0 : i32
    %c0_i32_1 = arith.constant 0 : i32
    return %c0_i32, %c0_i32_0 : i32, i32
  }
  func.func @transform_2(%arg0: i32) -> (i32, i32) {
    %c0_i32 = arith.constant 0 : i32
    %c0_i32_0 = arith.constant 0 : i32
    %c0_i32_1 = arith.constant 0 : i32
    return %c0_i32, %c0_i32_0 : i32, i32
  }
  func.func @transform_3(%arg0: i32) -> (i32, i32) {
    %c0_i32 = arith.constant 0 : i32
    %c0_i32_0 = arith.constant 0 : i32
    %c0_i32_1 = arith.constant 0 : i32
    return %c0_i32, %c0_i32_0 : i32, i32
  }
  func.func @transform_4(%arg0: i32) -> (i32, i32) {
    %c0_i32 = arith.constant 0 : i32
    %c0_i32_0 = arith.constant 0 : i32
    %c0_i32_1 = arith.constant 0 : i32
    return %c0_i32, %c0_i32_0 : i32, i32
  }
  func.func @transform_5(%arg0: i32) -> (i32, i32) {
    %c0_i32 = arith.constant 0 : i32
    %c0_i32_0 = arith.constant 0 : i32
    %c0_i32_1 = arith.constant 0 : i32
    return %c0_i32, %c0_i32_0 : i32, i32
  }
  func.func @transform_6(%arg0: i32) -> (i32, i32, i32) {
    %c0_i32 = arith.constant 0 : i32
    %c0_i32_0 = arith.constant 0 : i32
    %c0_i32_1 = arith.constant 0 : i32
    return %arg0, %c0_i32, %c0_i32_0 : i32, i32, i32
  }
}

</mosaic_0001>

<bundles_post_ra>
// kernel: tpu_custom_call.1
= control target key start
LH: loop header
LB: loop body
LE: loop exit
PB: predicated region body
PF: predicated region fallthrough
CT: control target
= control target key end

     0   :  { %11 = vsyncpa [#allocation3], 0  ;;  %s1705_s0 = inlined_call_operand.hbm [shape: bf16[2,8,32], index: 0, kind: input, shape index: {}]   ;;  %s1706_s1 = inlined_call_operand.vmem [shape: bf16[32,64], index: 1, kind: input, shape index: {}]   ;;  %s1707_s2 = inlined_call_operand.vmem [shape: bf16[32,64], index: 2, kind: input, shape index: {}]   ;;  %s1708_s3 = inlined_call_operand.vmem [shape: bf16[32,64], index: 3, kind: input, shape index: {}]   ;;  %s1709_s4 = inlined_call_operand.vmem [shape: bf16[64,32], index: 4, kind: input, shape index: {}]   ;;  %s1710_s5 = inlined_call_operand.vmem [shape: f32[1,32], index: 5, kind: input, shape index: {}]   ;;  %s1711_s6 = inlined_call_operand.hbm [shape: f32[2,8,32], index: 6, kind: output, shape index: {}]  }
   0x1   :  { %13 = vsyncpa [#allocation3 + $0x1], 0 }
   0x2   :  { %14 = vsyncpa [#allocation4], 0 }
   0x3   :  { %16 = vsyncpa [#allocation4 + $0x1], 0  ;;  %s1437_s21 = smov 0   ;;  %s1439_s22 = smov 0  }
   0x4   :  { %s1441_s23 = smov 0   ;;  %s1443_s24 = smov 0  }
   0x5 LB: > { %s1458_s25 = sadd.s32 4294967295, %s1390_s24   ;;  %s1069_s26 = sadd.s32 4294967294, %s1390_s24   ;;  %s1390_s24 = sphi %s1443_s24, %s1728_s24   ;;  %s1386_s23 = sphi %s1441_s23, %s1727_s23   ;;  %s1382_s22 = sphi %s1439_s22, %s1726_s22   ;;  %s1378_s21 = sphi %s1437_s21, %s1725_s21  }
   0x6   : > { %s1462_s27 = sadd.s32 1, %s1390_s24   ;;  %s29_s28 = sadd.s32 1, %s1386_s23 }
   0x7   : > { %s26_s29 = ssub.s32 %s1390_s24, %s1462_s27  ;;  %p36_p0 = scmp.ne.s32.totalorder %s1386_s23, %s1382_s22 }
   0x8   : > { %p27_p1 = scmp.eq.s32.totalorder %s26_s29, 0  ;;  %p37_p2 = scmp.eq.s32.totalorder %s1390_s24, 0 }
   0x9   : > { %p42_p3 = scmp.ne.s32.totalorder %s1382_s22, %s1378_s21  ;;  %p43_p4 = scmp.eq.s32.totalorder %s1458_s25, 0 }
   0xa   : > { %s1474_s30 = scalar_select %p27_p1, %s1386_s23, %s29_s28  }
   0xb   : > { %p1476_p5 = por %p37_p2, %p36_p0  ;;  %p1480_p6 = por %p43_p4, %p42_p3 }
   0xc   : > { %p171_p7 = scmp.eq.s32.totalorder %s1458_s25, 1  ;;  %p177_p8 = scmp.eq.s32.totalorder %s1069_s26, 1 }
   0xd   : > { %s1715_s8 = scalar_select %p1480_p6, 1, 0 }
   0xe   : > { %p1230_p10 = scmp.lt.s32.totalorder %s1390_s24, 2  ;;  %p1487_p11 = por %p171_p7, %p36_p0 }
   0xf   : > { %p1491_p12 = por %p177_p8, %p42_p3  ;;  %s212_s11 = sand.u32 1, %s1386_s23  }
  0x10   : > { %s1716_s9 = scalar_select %p1487_p11, 1, 0 }
  0x11   : > { %s1717_s10 = scalar_select %p1491_p12, 1, 0 }
  0x12   : > { %s1073_s12 = sshll.u32 %s1390_s24, 6  ;;  %s1072_s13 = sshll.u32 %s212_s11, 2 }
  0x13   : > { %s1500_s16 = scalar_lea.hbm %s1705_s0, %s1073_s12  ;;  %s216_s17 = scalar_lea.vmem [#allocation2], %s1072_s13 }
  0x14   : > { %s223_s18 = sshll.u32 %s216_s17, 4  ;;  %p1504_p13 = pnand %p1230_p10, %p1476_p5  ;;  %s1508_s18 = int_to_ptr.vmem [resolvable:$true] %s223_s18 }
  0x15   : > { %s213_s20 = scalar_lea.sflag [#allocation3], %s212_s11  ;;  %s1298_s26 = scalar_lea.hbm %s1500_s16, 64 }
  0x16   : > { %p1299_p2 = scmp.ne.s32.totalorder %s1500_s16, %s1298_s26  ;;  %p1300_p3 = pneg %p1504_p13 }
  0x17   : > { %s1303_s7 = scalar_lea.hbm %s1705_s0, 128  ;;  %p1304_p5 = scmp.lt.s32.totalorder %s1500_s16, %s1705_s0 }
  0x18   : > { %p1301_p4 = pnand %p1300_p3, %p1299_p2  ;;  %p1305_p8 = scmp.lt.s32.totalorder %s1303_s7, %s1298_s26 }
  0x1a   : > { %p1302_p7 = pneg %p1301_p4  ;;  %p1306_p10 = por %p1305_p8, %p1304_p5 }
  0x1c   : > { %p1307_p9 = pnand %p1306_p10, %p1302_p7 }
  0x1e   : > { %1310 = shalt.err (!%p1307_p9)
}
  0x1f   : > { %s1311_s11 = scalar_lea.vmem %s1508_s18, 64  ;;  %s1392_s14 = smov [#allocation2]  }
  0x20   : > { %p1312_p0 = scmp.ne.s32.totalorder %s1508_s18, %s1311_s11  ;;  %s1316_s15 = sshll.u32 %s1392_s14, 4  ;;  %s1317_s15 = int_to_ptr.vmem [resolvable:$false] %s1316_s15 }
  0x21   : > { %s1318_s17 = scalar_lea.vmem %s1317_s15, 128  ;;  %p1319_p4 = scmp.lt.s32.totalorder %s1508_s18, %s1317_s15 }
  0x22   : > { %p1314_p1 = pnand %p1312_p0, %p1300_p3  ;;  %p1320_p12 = scmp.lt.s32.totalorder %s1318_s17, %s1311_s11 }
  0x24   : > { %p1315_p2 = pneg %p1314_p1  ;;  %p1321_p11 = por %p1320_p12, %p1319_p4 }
  0x26   : > { %p1322_p6 = pnand %p1321_p11, %p1315_p2 }
  0x28   : > { %1325 = shalt.err (!%p1322_p6)
}
  0x29   : > { %1225 = dma.hbm_to_vmem [thread:$0]  (!%p1504_p13), %s1500_s16, 64, %s1508_s18, %s213_s20  }
  0x2a   : > { %p1719_p9 = scmp.lt.s32.totalorder %s1390_s24, 3  ;;  %p1720_p7 = scmp.ge.s32.totalorder %s1390_s24, 1 }
  0x2c   : > { %p229_p0 = pnand %p1720_p7, %p1719_p9 }
  0x2d   : > { %s1535_s26 = sand.u32 (!%p229_p0), 1, %s1382_s22   ;;  %p1721_p6 = scmp.ne.s32.totalorder (!%p229_p0), %s1715_s8, 0 }
  0x2e   : > { %232 = sbr.rel (%p229_p0) target bundleno = 1270 (0x4f6), region = 44  ;;  %s1075_s28 = sshll.u32 (!%p229_p0), %s1535_s26, 2 }
  0x2f   : > { %s235_s29 = scalar_lea.sflag (!%p229_p0), [#allocation3], %s1535_s26  ;;  %s238_s7 = scalar_lea.vmem (!%p229_p0), [#allocation2], %s1075_s28 }
  0x33   : > { %1369 = dma.done.wait (%p1721_p6), %s235_s29, 64  }
  0x34   : > { %1371 = vsyncadd (%p1721_p6), %s235_s29, 4294967232  ;;  %v1393_v0 = vmov 0.0   ;;  %vm1394_vm0 = vmmov 0   ;;  %v1272_v1 = vld [vmem:[%s1707_s2 + $0x8] sm:$0xff]   ;;  %v1274_v3 = vld [vmem:[%s1707_s2] sm:$0xff]   ;;  %vm285_vm1 = vcmask 261120  }
  0x35   : > { %1142 = vmatprep.subr.bf16.mxu1 %v1393_v0  ;;  %1134 = vmatprep.subr.bf16.mxu0 %v1393_v0  ;;  %v1273_v2 = vld [vmem:[%s1706_s1 + $0x8] sm:$0xff]   ;;  %v1275_v4 = vld [vmem:[%s1706_s1] sm:$0xff]   ;;  %vm444_vm2 = vcmask 130048   ;;  %s1395_s14 = smov 96   ;;  %s1396_s15 = smov 112   ;;  %vm491_vm3 = vcmask 64512  }
  0x36   : > { %1146 = vmatprep.mubr.msk.bf16.mxu1 %vm1394_vm0, %v1393_v0  ;;  %1138 = vmatprep.mubr.msk.bf16.mxu0 %vm1394_vm0, %v1393_v0  ;;  %v268_v5 = vld [vmem:[%s238_s7] sm:$0xf]  ;;  %s1397_s17 = smov 80   ;;  %v1276_v17 = vld [vmem:[%s1708_s3 + $0x8] sm:$0xff]   ;;  %vm506_vm4 = vcmask 1043456   ;;  %s1398_s11 = smov 16  }
  0x37   : > { %1143 = vmatpush3.bf16.msra.mxu1 %v1272_v1  ;;  %1135 = vmatpush3.bf16.msra.mxu0 %v1273_v2  ;;  %v1277_v18 = vld [vmem:[%s1708_s3] sm:$0xff]   ;;  %s1400_s28 = smov 48   ;;  %vm898_vm5 = vcmask 392192   ;;  %vm940_vm6 = vcmask 523264   ;;  %s1076_s29 = sshll.u32 %s1535_s26, 3 }
  0x38   : > { %1144 = vmatprep.subr.bf16.mxu1 %v1393_v0  ;;  %1136 = vmatprep.subr.bf16.mxu0 %v1393_v0  ;;  %s1101_s18 = sshll.u32 %s1458_s25, 7  ;;  %s266_s19 = scalar_lea.vmem [#allocation5], %s1076_s29 }
  0x39   : > { %s999_s20 = sshll.u32 %s266_s19, 4  ;;  %s1661_s13 = scalar_lea.hbm %s1711_s6, %s1101_s18  ;;  %s1663_s20 = int_to_ptr.vmem [resolvable:$true] %s999_s20 }
  0x3a   : > { %s1326_s25 = scalar_lea.vmem %s1663_s20, 128  ;;  %p1722_p12 = scmp.ne.s32.totalorder %s1716_s9, 0 }
  0x3b   : > { %1145 = vmatpush3.bf16.msra.mxu1 %v1274_v3  ;;  %1137 = vmatpush3.bf16.msra.mxu0 %v1275_v4  ;;  %p1327_p11 = scmp.ne.s32.totalorder %s1663_s20, %s1326_s25 }
  0x3c   : > { %1158 = vmatprep.subr.bf16.mxu1 %v1393_v0  ;;  %1150 = vmatprep.subr.bf16.mxu0 %v1393_v0 }
  0x3d   : > { %p1328_p13 = pnand %p1327_p11, %p1722_p12 }
  0x3e   : > { %1147 = vmatmul.mubr.msk.bf16.vlgmr.msra.gmra.mxu1 %vm285_vm1, %v268_v5  ;;  %1139 = vmatmul.mubr.msk.bf16.vlgmr.msra.gmra.mxu0 %vm285_vm1, %v268_v5 }
  0x3f   : > { %1160 = vmatprep.mubr.msk.bf16.mxu1 %vm1394_vm0, %v1393_v0  ;;  %1154 = vmatprep.mubr.msk.bf16.mxu0 %vm1394_vm0, %v1393_v0  ;;  %p1329_p1 = pneg %p1328_p13 }
  0x40   : > { %1151 = vmatpush3.bf16.msra.mxu0 %v1276_v17 }
  0x41   : > { %1152 = vmatprep.subr.bf16.mxu0 %v1393_v0 }
  0x44   : > { %1153 = vmatpush3.bf16.msra.mxu0 %v1277_v18 }
  0x45   : > { %1164 = vmatprep.subr.bf16.mxu0 %v1393_v0 }
  0x47   : > { %1155 = vmatmul.mubr.msk.bf16.vlgmr.msra.gmra.mxu0 %vm285_vm1, %v268_v5 }
  0x48   : > { %1166 = vmatprep.mubr.msk.bf16.mxu0 %vm1394_vm0, %v1393_v0 }
  0xfe   : > { %v379_v6 = vpop.f32.mrf.mxu1  ;;  %v323_v8 = vpop.f32.mrf.mxu0 }
  0xff   : > { %v442_v7 = vpack.c.bf16 %v379_v6, %v379_v6  ;;  %v441_v10 = vpack.c.bf16 %v323_v8, %v323_v8 }
 0x100   : > { %v1148_v9 = vpop.f32.mrf.mxu1  ;;  %v1140_v11 = vpop.f32.mrf.mxu0 }
 0x101   : > { %666 = vrot.lane.b32.xlu1 %v442_v7, %s1395_s14  ;;  %555 = vrot.lane.b32.xlu0 %v442_v7, %s1396_s15  ;;  %v449_v12 = vsel %vm444_vm2, %v442_v7, 0 }
 0x102   : > { %v382_v13 = vpop.f32.mrf.mxu1  ;;  %1159 = vmatpush3.bf16.xpose.msra.mxu1 %v449_v12  ;;  %v326_v14 = vpop.f32.mrf.mxu0 }
 0x103   : > { %1170 = vmatprep.subr.bf16.mxu1 %v1393_v0 }
 0x104   : > { %v1149_v15 = vpop.f32.mrf.mxu1  ;;  %v1141_v16 = vpop.f32.mrf.mxu0 }
 0x105   : > { %664 = vrot.lane.b32.xlu1 %v441_v10, %s1395_s14  ;;  %552 = vrot.lane.b32.xlu0 %v441_v10, %s1396_s15 }
 0x107   : > { %v435_v33 = vpop.f32.mrf.mxu0 }
 0x108   : > { %v443_v34 = vpack.c.bf16 %v435_v33, %v435_v33 }
 0x109   : > { %774 = vrot.lane.b32.xlu1 %v441_v10, %s1397_s17  ;;  %776 = vrot.lane.b32.xlu0 %v442_v7, %s1397_s17  ;;  %v1156_v35 = vpop.f32.mrf.mxu0 }
 0x10a   : > { %1161 = vmatmul.mubr.msk.bf16.vlgmr.msra.gmra.mxu1 %vm444_vm2, %v441_v10  ;;  %v508_v36 = vsel %vm506_vm4, %v443_v34, 0 }
 0x10b   : > { %1172 = vmatprep.mubr.msk.bf16.mxu1 %vm1394_vm0, %v1393_v0  ;;  %v438_v37 = vpop.f32.mrf.mxu0  ;;  %1165 = vmatpush3.bf16.msra.mxu0 %v508_v36  ;;  %v1281_v36 = vld [vmem:[%s1709_s4] sm:$0xff]  }
 0x10c   : > { %1176 = vmatprep.subr.bf16.mxu0 %v1393_v0 }
 0x10d   : > { %v1157_v38 = vpop.f32.mrf.mxu0 }
 0x173   : > { %v556_v19 = vpop.permute.xlu0 %555  ;;  %v667_v21 = vpop.permute.xlu1 %666 }
 0x174   : > { %v561_v20 = vsel %vm444_vm2, %v556_v19, 0  ;;  %v672_v23 = vsel %vm444_vm2, %v667_v21, 0 }
 0x175   : > { %1171 = vmatpush3.bf16.xpose.msra.mxu1 %v561_v20 }
 0x176   : > { %1182 = vmatprep.subr.bf16.mxu1 %v1393_v0 }
 0x177   : > { %v553_v22 = vpop.permute.xlu0 %552  ;;  %v665_v25 = vpop.permute.xlu1 %664 }
 0x17b   : > { %v777_v24 = vpop.permute.xlu0 %776  ;;  %v775_v27 = vpop.permute.xlu1 %774 }
 0x17c   : > { %1173 = vmatmul.mubr.msk.bf16.vlgmr.msra.gmra.mxu1 %vm444_vm2, %v553_v22  ;;  %v782_v26 = vsel %vm444_vm2, %v777_v24, 0 }
 0x17d   : > { %1183 = vmatpush3.bf16.xpose.msra.mxu1 %v672_v23  ;;  %1184 = vmatprep.mubr.msk.bf16.mxu1 %vm1394_vm0, %v1393_v0 }
 0x17e   : > { %1194 = vmatprep.subr.bf16.mxu1 %v1393_v0 }
 0x184   : > { %1185 = vmatmul.mubr.msk.bf16.vlgmr.msra.gmra.mxu1 %vm444_vm2, %v665_v25 }
 0x185   : > { %1195 = vmatpush3.bf16.xpose.msra.mxu1 %v782_v26  ;;  %1196 = vmatprep.mubr.msk.bf16.mxu1 %vm1394_vm0, %v1393_v0  ;;  %v1278_v26 = vld [vmem:[%s1709_s4 + $0x18] sm:$0xff]  }
 0x186   : > { %1206 = vmatprep.subr.bf16.mxu1 %v1393_v0 }
 0x18c   : > { %1197 = vmatmul.mubr.msk.bf16.vlgmr.msra.gmra.mxu1 %vm444_vm2, %v775_v27 }
 0x18d   : > { %1214 = vmatprep.mubr.msk.bf16.mxu1 %vm1394_vm0, %v1393_v0  ;;  %1207 = vmatpush3.bf16.msra.mxu1 %v1278_v26 }
 0x18e   : > { %1208 = vmatprep.subr.bf16.mxu1 %v1393_v0 }
 0x1ca   : > { %v485_v28 = vpop.f32.mrf.mxu1 }
 0x1cb   : > { %v492_v29 = vsel %vm491_vm3, %v485_v28, -inf }
 0x1cc   : > { %493 = vmax.xlane.f32.xlu0 %v492_v29  ;;  %v1162_v30 = vpop.f32.mrf.mxu1  ;;  %v1280_v29 = vld [vmem:[%s1709_s4 + $0x8] sm:$0xff]  }
 0x1ce   : > { %v488_v31 = vpop.f32.mrf.mxu1 }
 0x1d0   : > { %v1163_v32 = vpop.f32.mrf.mxu1 }
 0x23c   : > { %v597_v39 = vpop.f32.mrf.mxu1 }
 0x23d   : > { %v603_v40 = vsel %vm491_vm3, %v597_v39, -inf }
 0x23e   : > { %604 = vmax.xlane.f32.xlu1 %v603_v40  ;;  %v1174_v41 = vpop.f32.mrf.mxu1 }
 0x240   : > { %v600_v42 = vpop.f32.mrf.mxu1 }
 0x242   : > { %v1175_v43 = vpop.f32.mrf.mxu1 }
 0x244   : > { %v708_v44 = vpop.f32.mrf.mxu1 }
 0x245   : > { %v714_v45 = vsel %vm491_vm3, %v708_v44, -inf }
 0x246   : > { %715 = vmax.xlane.f32.xlu0 %v714_v45  ;;  %v1186_v46 = vpop.f32.mrf.mxu1 }
 0x248   : > { %v711_v47 = vpop.f32.mrf.mxu1 }
 0x24a   : > { %v1187_v48 = vpop.f32.mrf.mxu1 }
 0x24c   : > { %v818_v49 = vpop.f32.mrf.mxu1 }
 0x24d   : > { %v824_v50 = vsel %vm491_vm3, %v818_v49, -inf }
 0x24e   : > { %825 = vmax.xlane.f32.xlu0 %v824_v50  ;;  %v1198_v51 = vpop.f32.mrf.mxu1 }
 0x24f   : > { %615 = vrot.lane.b32.xlu1 %v443_v34, %s1396_s15 }
 0x250   : > { %v821_v52 = vpop.f32.mrf.mxu1 }
 0x252   : > { %v1199_v53 = vpop.f32.mrf.mxu1 }
 0x253   : > { %835 = vrot.lane.b32.xlu1 %v443_v34, %s1397_s17  ;;  %s1399_s17 = smov 32  }
 0x255   : > { %v494_v54 = vpop.xlane.xlu0 %493 }
 0x256   : > { %v495_v55 = vsub.f32 %v485_v28, %v494_v54  ;;  %v1279_v28 = vld [vmem:[%s1709_s4 + $0x10] sm:$0xff]  }
 0x257   : > { %1209 = vmatpush3.bf16.msra.mxu1 %v1279_v28 }
 0x258   : > { %v496_v56 = vmul.f32 1.442695, %v495_v55  ;;  %1210 = vmatprep.subr.bf16.mxu1 %v1393_v0 }
 0x25a   : > { %1282 = vpow2.f32 %v496_v56 }
 0x25b   : > { %1211 = vmatpush3.bf16.msra.mxu1 %v1280_v29 }
 0x25c   : > { %1212 = vmatprep.subr.bf16.mxu1 %v1393_v0 }
 0x25f   : > { %1213 = vmatpush3.bf16.msra.mxu1 %v1281_v36 }
 0x264   : > { %725 = vrot.lane.b32.xlu0 %v443_v34, %s1395_s14  ;;  %s1401_s14 = smov [#allocation5]  }
 0x265   : > { %s1330_s15 = sshll.u32 %s1401_s14, 4  ;;  %s1331_s15 = int_to_ptr.vmem [resolvable:$false] %s1330_s15 }
 0x266   : > { %p1333_p3 = scmp.lt.s32.totalorder %s1663_s20, %s1331_s15 }
 0x267   : > { %v1283_v57 = vpop.eup %1282 }
 0x268   : > { %v502_v58 = vpack.c.bf16 %v1283_v57, %v1283_v57  ;;  %v498_v12 = vsel %vm491_vm3, %v1283_v57, 0.0 }
 0x26a   : > { %1167 = vmatmul.mubr.msk.bf16.vlgmr.msra.gmra.mxu0 %vm491_vm3, %v502_v58 }
 0x26b   : > { %1178 = vmatprep.mubr.msk.bf16.mxu0 %vm1394_vm0, %v1393_v0 }
 0x2c7   : > { %v605_v59 = vpop.xlane.xlu1 %604 }
 0x2c8   : > { %v606_v60 = vsub.f32 %v597_v39, %v605_v59  ;;  %v1094_v59 = vld [vmem:[%s1710_s5] ss:$0 sm:$0xff] }
 0x2ca   : > { %v607_v61 = vmul.f32 1.442695, %v606_v60 }
 0x2cb   : > { %v616_v62 = vpop.permute.xlu1 %615 }
 0x2cc   : > { %1284 = vpow2.f32 %v607_v61  ;;  %v621_v63 = vsel %vm506_vm4, %v616_v62, 0 }
 0x2cd   : > { %1177 = vmatpush3.bf16.msra.mxu0 %v621_v63 }
 0x2ce   : > { %1188 = vmatprep.subr.bf16.mxu0 %v1393_v0 }
 0x2cf   : > { %v716_v1 = vpop.xlane.xlu0 %715  ;;  %v836_v14 = vpop.permute.xlu1 %835 }
 0x2d0   : > { %v717_v2 = vsub.f32 %v708_v44, %v716_v1  ;;  %v841_v17 = vsel %vm506_vm4, %v836_v14, 0 }
 0x2d2   : > { %v718_v3 = vmul.f32 1.442695, %v717_v2 }
 0x2d4   : > { %1286 = vpow2.f32 %v718_v3 }
 0x2d7   : > { %v826_v4 = vpop.xlane.xlu0 %825 }
 0x2d8   : > { %v827_v5 = vsub.f32 %v818_v49, %v826_v4 }
 0x2d9   : > { %v1285_v6 = vpop.eup %1284 }
 0x2da   : > { %v828_v7 = vmul.f32 1.442695, %v827_v5  ;;  %v609_v8 = vsel %vm491_vm3, %v1285_v6, 0.0  ;;  %v613_v9 = vpack.c.bf16 %v1285_v6, %v1285_v6 }
 0x2db   : > { %v726_v10 = vpop.permute.xlu0 %725  ;;  %610 = vadd.xlane.f32.xlu1 %v609_v8 }
 0x2dc   : > { %1288 = vpow2.f32 %v828_v7  ;;  %v731_v11 = vsel %vm506_vm4, %v726_v10, 0  ;;  %1179 = vmatmul.mubr.msk.bf16.vlgmr.msra.gmra.mxu0 %vm491_vm3, %v613_v9 }
 0x2dd   : > { %1189 = vmatpush3.bf16.msra.mxu0 %v731_v11  ;;  %1190 = vmatprep.mubr.msk.bf16.mxu0 %vm1394_vm0, %v1393_v0 }
 0x2de   : > { %1200 = vmatprep.subr.bf16.mxu0 %v1393_v0 }
 0x2df   : > { %499 = vadd.xlane.f32.xlu1 %v498_v12 }
 0x2e1   : > { %v1287_v13 = vpop.eup %1286 }
 0x2e2   : > { %v720_v15 = vsel %vm491_vm3, %v1287_v13, 0.0  ;;  %v724_v16 = vpack.c.bf16 %v1287_v13, %v1287_v13 }
 0x2e3   : > { %721 = vadd.xlane.f32.xlu0 %v720_v15 }
 0x2e4   : > { %1191 = vmatmul.mubr.msk.bf16.vlgmr.msra.gmra.mxu0 %vm491_vm3, %v724_v16 }
 0x2e5   : > { %1201 = vmatpush3.bf16.msra.mxu0 %v841_v17  ;;  %1202 = vmatprep.mubr.msk.bf16.mxu0 %vm1394_vm0, %v1393_v0 }
 0x2e9   : > { %v1289_v18 = vpop.eup %1288 }
 0x2ea   : > { %v830_v19 = vsel %vm491_vm3, %v1289_v18, 0.0  ;;  %v834_v20 = vpack.c.bf16 %v1289_v18, %v1289_v18 }
 0x2eb   : > { %831 = vadd.xlane.f32.xlu0 %v830_v19 }
 0x2ec   : > { %1203 = vmatmul.mubr.msk.bf16.vlgmr.msra.gmra.mxu0 %vm491_vm3, %v834_v20 }
 0x32a   : > { %v544_v21 = vpop.f32.mrf.mxu0 }
 0x32c   : > { %v1168_v22 = vpop.f32.mrf.mxu0 }
 0x32e   : > { %v547_v23 = vpop.f32.mrf.mxu0 }
 0x330   : > { %v1169_v24 = vpop.f32.mrf.mxu0 }
 0x364   : > { %v611_v25 = vpop.xlane.xlu1 %610 }
 0x365   : > { %1290 = vrcp.f32 %v611_v25 }
 0x368   : > { %v500_v49 = vpop.xlane.xlu1 %499 }
 0x36c   : > { %v722_v27 = vpop.xlane.xlu0 %721 }
 0x36d   : > { %1292 = vrcp.f32 %v722_v27 }
 0x372   : > { %v1291_v30 = vpop.eup %1290 }
 0x374   : > { %v832_v31 = vpop.xlane.xlu0 %831 }
 0x375   : > { %1294 = vrcp.f32 %v832_v31 }
 0x376   : > { %1296 = vrcp.f32 %v500_v49 }
 0x37a   : > { %v1293_v38 = vpop.eup %1292 }
 0x382   : > { %v1295_v44 = vpop.eup %1294 }
 0x383   : > { %v1297_v50 = vpop.eup %1296 }
 0x384   : > { %v550_v53 = vmul.f32 %v1297_v50, %v544_v21 }
 0x39c   : > { %v657_v32 = vpop.f32.mrf.mxu0 }
 0x39d   : > { %v663_v33 = vmul.f32 %v1291_v30, %v657_v32 }
 0x39e   : > { %v1180_v34 = vpop.f32.mrf.mxu0 }
 0x39f   : > { %885 = vrot.lane.b32.xlu0 %v663_v33, %s1398_s11  ;;  %s986_s11 = scalar_lea.sflag [#allocation4], %s1535_s26 }
 0x3a0   : > { %v660_v35 = vpop.f32.mrf.mxu0 }
 0x3a2   : > { %v1181_v37 = vpop.f32.mrf.mxu0 }
 0x3a4   : > { %v767_v39 = vpop.f32.mrf.mxu0 }
 0x3a5   : > { %v773_v40 = vmul.f32 %v1293_v38, %v767_v39 }
 0x3a6   : > { %v1192_v41 = vpop.f32.mrf.mxu0 }
 0x3a7   : > { %889 = vrot.lane.b32.xlu1 %v773_v40, %s1399_s17  ;;  %s1332_s17 = scalar_lea.vmem %s1331_s15, 256 }
 0x3a8   : > { %v770_v42 = vpop.f32.mrf.mxu0  ;;  %p1334_p5 = scmp.lt.s32.totalorder %s1332_s17, %s1326_s25 }
 0x3aa   : > { %v1193_v43 = vpop.f32.mrf.mxu0  ;;  %p1335_p8 = por %p1334_p5, %p1333_p3 }
 0x3ac   : > { %v877_v45 = vpop.f32.mrf.mxu0  ;;  %p1336_p10 = pnand %p1335_p8, %p1329_p1 }
 0x3ad   : > { %v883_v46 = vmul.f32 %v1295_v44, %v877_v45 }
 0x3ae   : > { %v1204_v47 = vpop.f32.mrf.mxu0 }
 0x3af   : > { %893 = vrot.lane.b32.xlu1 %v883_v46, %s1400_s28 }
 0x3b0   : > { %v880_v0 = vpop.f32.mrf.mxu0 }
 0x3b2   : > { %v1205_v48 = vpop.f32.mrf.mxu0 }
 0x411   : > { %v886_v51 = vpop.permute.xlu0 %885 }
 0x412   : > { %v896_v54 = vsel %vm444_vm2, %v550_v53, %v886_v51 }
 0x419   : > { %v890_v52 = vpop.permute.xlu1 %889 }
 0x41a   : > { %v897_v55 = vsel %vm285_vm1, %v896_v54, %v890_v52 }
 0x421   : > { %v894_v56 = vpop.permute.xlu1 %893 }
 0x422   : > { %v899_v57 = vsel %vm898_vm5, %v897_v55, %v894_v56 }
 0x423   : > { %v900_v58 = vpack.c.bf16 %v899_v57, %v899_v57 }
 0x425   : > { %1215 = vmatmul.mubr.msk.bf16.vlgmr.msra.gmra.mxu1 %vm940_vm6, %v900_v58 }
 0x4e5   : > { %v978_v60 = vpop.f32.mrf.mxu1 }
 0x4e6   : > { %v979_v61 = vadd.f32 %v1094_v59, %v978_v60 }
 0x4e7   : > { %v1216_v62 = vpop.f32.mrf.mxu1 }
 0x4e8   : > { %984 = vst.msk [vmem:[%s266_s19] sm:$0xff] %vm285_vm1, %v979_v61 }
 0x4e9   : > { %v981_v63 = vpop.f32.mrf.mxu1 }
 0x4ea   : > { %1339 = shalt.err (!%p1336_p10)
}
 0x4eb   : > { %s1340_s28 = scalar_lea.hbm %s1661_s13, 128  ;;  %s1344_s7 = scalar_lea.hbm %s1711_s6, 256 }
 0x4ec   : > { %p1341_p2 = scmp.ne.s32.totalorder %s1661_s13, %s1340_s28  ;;  %p1345_p7 = scmp.lt.s32.totalorder %s1661_s13, %s1711_s6 }
 0x4ed   : > { %p1346_p0 = scmp.lt.s32.totalorder %s1344_s7, %s1340_s28 }
 0x4ee   : > { %p1342_p4 = pnand %p1341_p2, %p1722_p12 }
 0x4ef   : > { %p1347_p6 = por %p1346_p0, %p1345_p7 }
 0x4f0   : > { %p1343_p9 = pneg %p1342_p4 }
 0x4f2   : > { %p1348_p11 = pnand %p1347_p6, %p1343_p9 }
 0x4f4   : > { %1351 = shalt.err (!%p1348_p11)
}
 0x4f5   : > { %1220 = dma.vmem_to_hbm [thread:$0]  (%p1722_p12), %s1663_s20, 128, %s1661_s13, %s986_s11   ;;  %v1217_v1 = vpop.f32.mrf.mxu1 }
 0x4f6 PF: > { %s1011_s19 = sand.u32 1, %s1378_s21   ;;  %p1723_p13 = scmp.ne.s32.totalorder %s1717_s10, 0 }
 0x4f7   : > { %p1724_p1 = scmp.ge.s32.totalorder %s1390_s24, 2  ;;  %s1012_s8 = scalar_lea.sflag [#allocation4], %s1011_s19 }
 0x4f9   : > { %p1227_p3 = pnand %p1724_p1, %p1723_p13 }
 0x4fb   : > { %p1228_p5 = pneg %p1227_p3 }
 0x4fd   : > { %1373 = dma.done.wait (%p1228_p5), %s1012_s8, 128  }
 0x4fe   : > { %1375 = vsyncadd (%p1228_p5), %s1012_s8, 4294967168  ;;  %p19_p8 = scmp.ge.s32.totalorder %s1462_s27, 4   ;;  %s1725_s21 = smov %s1382_s22 }
 0x4ff   : > { %s1726_s22 = smov %s1386_s23  ;;  %s1727_s23 = smov %s1474_s30 }
 0x500   : > { %s1728_s24 = smov %s1462_s27  ;;  %21 = sbr.rel (!%p19_p8) target bundleno = 5 (0x5), region = 89 }
 0x505   :  { %1017 = vsyncpa [#allocation3], 1 }
 0x506   :  { %1019 = vsyncpa [#allocation3 + $0x1], 1 }
 0x507   :  { %1020 = vsyncpa [#allocation4], 1 }
 0x508   :  { %1022 = vsyncpa [#allocation4 + $0x1], 1 }

</bundles_post_ra>
